<compile_context>
chip_gen: v5e
topology: v5e:2x2
jax: 0.10.0
libtpu: 0.0.40
codegen_flags: <defaults>
</compile_context>

<pallas_src>
import jax
import jax.numpy as jnp
from jax.experimental import pallas as pl
from jax.experimental.pallas import tpu as pltpu


def _two_layer_kernel(x_ref, w1_ref, w2_ref, o_ref, acc_ref):
    """Grid = (batch tile i, hidden tile k).  k is a reduction axis."""
    k = pl.program_id(1)

    @pl.when(k == 0)
    def _():
        acc_ref[...] = jnp.zeros_like(acc_ref)

    # Cast x in-kernel (avoids a separate wrapper-side HBM pass over x).
    x = x_ref[...].astype(w1_ref.dtype)
    # First matmul on the MXU, f32 accumulation.
    h = jnp.dot(x, w1_ref[...], preferred_element_type=jnp.float32)
    # Downcast before ReLU (exact for max(., 0)) -> bf16 VPU op on v6e/v7x.
    h = jnp.maximum(h.astype(w2_ref.dtype), 0)
    # Second matmul contribution of this hidden tile, accumulated in f32.
    acc_ref[...] += jnp.dot(h, w2_ref[...], preferred_element_type=jnp.float32)

    @pl.when(k == pl.num_programs(1) - 1)
    def _():
        o_ref[...] = acc_ref[...].astype(o_ref.dtype)


def _round_up(n, m):
    return (n + m - 1) // m * m


def _cdiv(a, b):
    return (a + b - 1) // b


def _pad2d(a, rows, cols, dtype=None):
    if dtype is not None and a.dtype != dtype:
        a = a.astype(dtype)
    pr, pc = rows - a.shape[0], cols - a.shape[1]
    if pr or pc:
        a = jnp.pad(a, ((0, pr), (0, pc)))
    return a


def _vmem_budget_bytes():
    try:
        cap = pltpu.get_tpu_info().vmem_capacity_bytes
    except Exception:
        cap = 64 << 20  # conservative fallback: v7x per-TensorCore VMEM
    # Leave headroom for compiler-internal scratch; never ask for > ~100 MiB.
    return min(cap - (8 << 20), 100 << 20)


def two_layer_forward(x, w1, w2, *, block_batch=256, compute_dtype=jnp.bfloat16):
    B, Din = x.shape
    Din2, H = w1.shape
    H2, Dout = w2.shape
    assert Din == Din2 and H == H2
    out_dtype = x.dtype

    elt_c = jnp.dtype(compute_dtype).itemsize
    elt_x = jnp.dtype(x.dtype).itemsize
    elt_o = jnp.dtype(out_dtype).itemsize

    # Lane dims -> multiples of 128 (zero padding is exact: relu(0)=0, zero
    # rows/cols contribute nothing, padded batch rows are sliced off).
    Din_p = _round_up(Din, 128)
    H_p = _round_up(H, 128)
    Dout_p = _round_up(Dout, 128)

    # ---- Batch tiling: multiple of 16, bounded padding waste, and >=2 tiles
    # when possible so both v7x TensorCores are fed. ----
    B_16 = _round_up(B, 16)
    tb_cap = max(16, _round_up(block_batch, 16))
    nb = _cdiv(B_16, min(tb_cap, B_16))
    if nb == 1 and B_16 >= 32:
        nb = 2  # megacore: 2 grid steps for v7x's 2 TCs; negligible on 1-TC chips
    tb = _round_up(_cdiv(B_16, nb), 16)
    B_p = nb * tb

    # ---- Hidden (reduction) tiling: keep resident weight footprint inside
    # the VMEM budget.  Prefer full-H residency (weights fetched exactly once,
    # single-buffered); otherwise stream 256-wide H tiles (v6e/v7x MXU). ----
    budget = _vmem_budget_bytes()

    def footprint(th, w_bufs):
        w = (Din_p * th + th * Dout_p) * elt_c * w_bufs
        xb = tb * Din_p * elt_x * 2          # x tile, double-buffered
        ob = tb * Dout_p * elt_o * 2         # out tile, double-buffered
        acc = tb * Dout_p * 4                # f32 accumulator scratch
        hbuf = tb * th * 4                   # intermediate activation headroom
        return w + xb + ob + acc + hbuf

    if footprint(H_p, 1) <= budget:
        th, w_bufs = H_p, 1                  # weights fully VMEM-resident
    else:
        w_bufs = 2                           # streamed tiles -> double-buffer
        nk_try = 2
        while True:
            th = max(256, _round_up(_cdiv(H_p, nk_try), 256))
            if footprint(th, w_bufs) <= budget or th == 256:
                break
            nk_try += 1
    nk = _cdiv(H_p, th)
    H_pad = nk * th

    # x: pad only when required; dtype cast happens inside the kernel.
    xp = x if (B_p, Din_p) == x.shape else _pad2d(x, B_p, Din_p)
    # Weights: pad + cast once.  (In real use hoist this out of the per-call
    # path, since the weights are reused across calls.)
    w1p = _pad2d(w1, Din_p, H_pad, compute_dtype)
    w2p = _pad2d(w2, H_pad, Dout_p, compute_dtype)

    cost = pl.CostEstimate(
        flops=2 * B_p * Din_p * H_pad + 2 * B_p * H_pad * Dout_p,
        transcendentals=0,
        bytes_accessed=(xp.size * elt_x
                        + (w1p.size + w2p.size) * elt_c * (nb if nk > 1 else 1)
                        + B_p * Dout_p * elt_o),
    )

    vmem_limit = int(min(budget, max(footprint(th, w_bufs) * 1.25, 16 << 20)))

    out_padded = pl.pallas_call(
        _two_layer_kernel,
        out_shape=jax.ShapeDtypeStruct((B_p, Dout_p), out_dtype),
        grid_spec=pltpu.PrefetchScalarGridSpec(
            num_scalar_prefetch=0,
            grid=(nb, nk),
            in_specs=[
                # x: tiled over batch, resident across the hidden (k) loop.
                pl.BlockSpec((tb, Din_p), lambda i, k: (i, 0)),
                # W1 / W2: tiled over the hidden dim.  Single-buffered when
                # fully resident (nk == 1); double-buffered when streaming.
                pl.BlockSpec((Din_p, th), lambda i, k: (0, k),
                             pipeline_mode=pl.Buffered(w_bufs)),
                pl.BlockSpec((th, Dout_p), lambda i, k: (k, 0),
                             pipeline_mode=pl.Buffered(w_bufs)),
            ],
            out_specs=pl.BlockSpec((tb, Dout_p), lambda i, k: (i, 0)),
            scratch_shapes=[pltpu.VMEM((tb, Dout_p), jnp.float32)],
        ),
        compiler_params=pltpu.CompilerParams(
            dimension_semantics=("parallel", "arbitrary"),
            vmem_limit_bytes=vmem_limit,
        ),
        cost_estimate=cost,
    )(xp, w1p, w2p)

    return out_padded[:B, :Dout]


def reference_forward_f32(x, w1, w2):
    return jnp.maximum(x @ w1, 0.0) @ w2


def reference_forward_bf16(x, w1, w2):
    # Same mixed-precision recipe as the kernel (bf16 operands, f32 accum).
    xb, w1b, w2b = (a.astype(jnp.bfloat16) for a in (x, w1, w2))
    h = jnp.dot(xb, w1b, preferred_element_type=jnp.float32)
    h = jnp.maximum(h, 0.0).astype(jnp.bfloat16)
    return jnp.dot(h, w2b, preferred_element_type=jnp.float32).astype(x.dtype)


if __name__ == "__main__":
    key = jax.random.PRNGKey(0)
    k_x, k_w1, k_w2 = jax.random.split(key, 3)

    # Small shapes consistent with a two-layer MLP forward.
    batch, d_in, d_hidden, d_out = 8, 32, 64, 32
    x = jax.random.normal(k_x, (batch, d_in), dtype=jnp.float32)
    w1 = jax.random.normal(k_w1, (d_in, d_hidden), dtype=jnp.float32) * 0.1
    w2 = jax.random.normal(k_w2, (d_hidden, d_out), dtype=jnp.float32) * 0.1

    out = jax.block_until_ready(two_layer_forward(x, w1, w2))
    assert out.shape == (batch, d_out)

    # Tight check against a reference using the same bf16/f32 mixed precision.
    ref_bf16 = reference_forward_bf16(x, w1, w2)
    assert jnp.allclose(out, ref_bf16, atol=2e-3, rtol=2e-3)

    # Loose sanity check against the pure-f32 reference (bf16 rounding allowed).
    # TODO(synk): expose a pure-f32 MXU path if full f32 fidelity is required.
    ref_f32 = reference_forward_f32(x, w1, w2)
    assert jnp.allclose(out, ref_f32, atol=5e-2, rtol=5e-2)

    print("KERNEL_OK")
</pallas_src>

<mosaic_0001>
module attributes {stable_mosaic.version = 11 : i64} {
  func.func @_two_layer_kernel(%arg0: i32, %arg1: i32, %arg2: memref<16x128xf32, #tpu.memory_space<vmem>>, %arg3: memref<128x128xbf16, #tpu.memory_space<vmem>>, %arg4: memref<128x128xbf16, #tpu.memory_space<vmem>>, %arg5: memref<16x128xf32, #tpu.memory_space<vmem>>, %arg6: memref<16x128xf32, #tpu.memory_space<vmem>>) attributes {dimension_semantics = [#tpu.dimension_semantics<parallel>, #tpu.dimension_semantics<arbitrary>], iteration_bounds = array<i64: 1, 1>, scalar_prefetch = 0 : i64, scratch_operands = 1 : i64, tpu.core_type = #tpu.core_type<tc>, window_params = [{transform_indices = @transform_0, window_bounds = array<i64: 16, 128>}, {pipeline_mode = #tpu.pipeline_mode<synchronous>, transform_indices = @transform_1, window_bounds = array<i64: 128, 128>}, {pipeline_mode = #tpu.pipeline_mode<synchronous>, transform_indices = @transform_2, window_bounds = array<i64: 128, 128>}, {transform_indices = @transform_3, window_bounds = array<i64: 16, 128>}]} {
    %c0_i32 = arith.constant 0 : i32
    %0 = arith.cmpi eq, %arg1, %c0_i32 : i32
    %1 = arith.extui %0 : i1 to i32
    %c0_i32_0 = arith.constant 0 : i32
    %2 = arith.cmpi ne, %1, %c0_i32_0 : i32
    scf.if %2 {
      %cst_14 = arith.constant 0.000000e+00 : f32
      %18 = vector.broadcast %cst_14 : f32 to vector<16x128xf32>
      %c0_15 = arith.constant 0 : index
      %c0_16 = arith.constant 0 : index
      %19 = vector.load %arg6[%c0_15, %c0_16] : memref<16x128xf32, #tpu.memory_space<vmem>>, vector<16x128xf32>
      tpu.vector_store %arg6[%c0_15, %c0_16], %18 {strides = array<i32>} : memref<16x128xf32, #tpu.memory_space<vmem>>, vector<16x128xf32>,
    } else {
    }
    %c0 = arith.constant 0 : index
    %c0_1 = arith.constant 0 : index
    %3 = vector.load %arg2[%c0, %c0_1] : memref<16x128xf32, #tpu.memory_space<vmem>>, vector<16x128xf32>
    %4 = arith.truncf %3 : vector<16x128xf32> to vector<16x128xbf16>
    %c0_2 = arith.constant 0 : index
    %c0_3 = arith.constant 0 : index
    %5 = vector.load %arg3[%c0_2, %c0_3] : memref<128x128xbf16, #tpu.memory_space<vmem>>, vector<128x128xbf16>
    %cst = arith.constant dense<0.000000e+00> : vector<16x128xf32>
    %6 = tpu.matmul %4, %5, %cst {dimension_numbers = #tpu.dot_dimension_numbers<[1], [0], [0], [1], [0, 0, 1, 1], [], []>} : vector<16x128xbf16>, vector<128x128xbf16>, vector<16x128xf32> -> vector<16x128xf32>
    %7 = arith.truncf %6 : vector<16x128xf32> to vector<16x128xbf16>
    %cst_4 = arith.constant 0.000000e+00 : bf16
    %8 = vector.broadcast %cst_4 : bf16 to vector<16x128xbf16>
    %9 = arith.maximumf %7, %8 : vector<16x128xbf16>
    %c0_5 = arith.constant 0 : index
    %c0_6 = arith.constant 0 : index
    %10 = vector.load %arg6[%c0_5, %c0_6] : memref<16x128xf32, #tpu.memory_space<vmem>>, vector<16x128xf32>
    %c0_7 = arith.constant 0 : index
    %c0_8 = arith.constant 0 : index
    %11 = vector.load %arg4[%c0_7, %c0_8] : memref<128x128xbf16, #tpu.memory_space<vmem>>, vector<128x128xbf16>
    %cst_9 = arith.constant dense<0.000000e+00> : vector<16x128xf32>
    %12 = tpu.matmul %9, %11, %cst_9 {dimension_numbers = #tpu.dot_dimension_numbers<[1], [0], [0], [1], [0, 0, 1, 1], [], []>} : vector<16x128xbf16>, vector<128x128xbf16>, vector<16x128xf32> -> vector<16x128xf32>
    %13 = arith.addf %10, %12 : vector<16x128xf32>
    %c0_10 = arith.constant 0 : index
    %c0_11 = arith.constant 0 : index
    %14 = vector.load %arg6[%c0_10, %c0_11] : memref<16x128xf32, #tpu.memory_space<vmem>>, vector<16x128xf32>
    tpu.vector_store %arg6[%c0_10, %c0_11], %13 {strides = array<i32>} : memref<16x128xf32, #tpu.memory_space<vmem>>, vector<16x128xf32>,
    %c0_i32_12 = arith.constant 0 : i32
    %15 = arith.cmpi eq, %arg1, %c0_i32_12 : i32
    %16 = arith.extui %15 : i1 to i32
    %c0_i32_13 = arith.constant 0 : i32
    %17 = arith.cmpi ne, %16, %c0_i32_13 : i32
    scf.if %17 {
      %c0_14 = arith.constant 0 : index
      %c0_15 = arith.constant 0 : index
      %18 = vector.load %arg6[%c0_14, %c0_15] : memref<16x128xf32, #tpu.memory_space<vmem>>, vector<16x128xf32>
      %c0_16 = arith.constant 0 : index
      %c0_17 = arith.constant 0 : index
      %19 = vector.load %arg5[%c0_16, %c0_17] : memref<16x128xf32, #tpu.memory_space<vmem>>, vector<16x128xf32>
      tpu.vector_store %arg5[%c0_16, %c0_17], %18 {strides = array<i32>} : memref<16x128xf32, #tpu.memory_space<vmem>>, vector<16x128xf32>,
    } else {
    }
    return
  }
  func.func @transform_0(%arg0: i32, %arg1: i32) -> (i32, i32) {
    %c0_i32 = arith.constant 0 : i32
    %c0_i32_0 = arith.constant 0 : i32
    return %arg0, %c0_i32 : i32, i32
  }
  func.func @transform_1(%arg0: i32, %arg1: i32) -> (i32, i32) {
    %c0_i32 = arith.constant 0 : i32
    %c0_i32_0 = arith.constant 0 : i32
    return %c0_i32, %arg1 : i32, i32
  }
  func.func @transform_2(%arg0: i32, %arg1: i32) -> (i32, i32) {
    %c0_i32 = arith.constant 0 : i32
    %c0_i32_0 = arith.constant 0 : i32
    return %arg1, %c0_i32 : i32, i32
  }
  func.func @transform_3(%arg0: i32, %arg1: i32) -> (i32, i32) {
    %c0_i32 = arith.constant 0 : i32
    %c0_i32_0 = arith.constant 0 : i32
    return %arg0, %c0_i32 : i32, i32
  }
}

</mosaic_0001>

<bundles_post_ra>
// kernel: tpu_custom_call.1
= control target key start
LH: loop header
LB: loop body
LE: loop exit
PB: predicated region body
PF: predicated region fallthrough
CT: control target
= control target key end

     0   :  { %8 = vsyncpa [#allocation4], 0  ;;  %s503_s0 = inlined_call_operand.hbm [shape: f32[16,128], index: 0, kind: input, shape index: {}]   ;;  %s504_s1 = inlined_call_operand.hbm [shape: bf16[128,128], index: 1, kind: input, shape index: {}]   ;;  %s505_s2 = inlined_call_operand.hbm [shape: bf16[128,128], index: 2, kind: input, shape index: {}]   ;;  %s506_s3 = inlined_call_operand.hbm [shape: f32[16,128], index: 3, kind: output, shape index: {}]  }
   0x1   :  { %9 = vsyncpa [#allocation7], 0  ;;  %s28_s14 = sshll.u32 %s504_s1, 4  ;;  %s29_s14 = int_to_ptr.hbm [resolvable:$true] %s28_s14 }
   0x2   :  { %10 = vsyncpa [#allocation5], 0  ;;  %s457_s15 = smov [#allocation6]   ;;  %s15_s19 = sshll.u32 %s503_s0, 4  ;;  %s16_s19 = int_to_ptr.hbm [resolvable:$true] %s15_s19 }
   0x3   :  { %s30_s16 = sshll.u32 %s457_s15, 4  ;;  %s458_s20 = smov 64   ;;  %s31_s16 = int_to_ptr.vmem [resolvable:$true] %s30_s16 }
   0x4   :  { %s459_s21 = smov 4   ;;  %s460_s22 = smov [#allocation3]  }
   0x5   :  { %36 = dma.hbm_to_vmem [thread:$0]  %s29_s14, 1024, %s31_s16, [#allocation7], %s458_s20, %s458_s20, %s459_s21  }
   0x6   :  { %s17_s23 = sshll.u32 %s460_s22, 4  ;;  %s461_s24 = smov 128   ;;  %s18_s23 = int_to_ptr.vmem [resolvable:$true] %s17_s23 }
   0x7   :  { %s462_s25 = smov 8   ;;  %s41_s27 = sshll.u32 %s505_s2, 4  ;;  %s42_s27 = int_to_ptr.hbm [resolvable:$true] %s41_s27 }
   0x8   :  { %23 = dma.hbm_to_vmem [thread:$0]  %s16_s19, 256, %s18_s23, [#allocation4], %s461_s24, %s461_s24, %s462_s25  }
   0x9   :  { %s463_s28 = smov [#allocation8]  }
   0xa   :  { %s43_s0 = sshll.u32 %s463_s28, 4  ;;  %s44_s0 = int_to_ptr.vmem [resolvable:$true] %s43_s0 }
   0xb   :  { %49 = dma.hbm_to_vmem [thread:$0]  %s42_s27, 1024, %s44_s0, [#allocation7], %s458_s20, %s458_s20, %s459_s21  }
   0xc   :  { %451 = dma.done.wait [#allocation4], 256  }
   0xd   :  { %452 = vsyncadd [#allocation4], 4294967040 }
   0xe   :  { %453 = dma.done.wait [#allocation7], 2048  }
   0xf   :  { %454 = vsyncadd [#allocation7], 4294965248  ;;  %v338_v0 = vld [vmem:[#allocation6 + $0x38] sm:$0xff]  ;;  %v337_v1 = vld [vmem:[#allocation6 + $0x30] sm:$0xff]  ;;  %s464_s2 = smov [#allocation9]   ;;  %s253_s5 = sshll.u32 %s506_s3, 4  ;;  %s254_s5 = int_to_ptr.hbm [resolvable:$true] %s253_s5 }
  0x10   :  { %135 = vmatpush.bf16.msra.mxu0 %v338_v0  ;;  %v346_v2 = vld [vmem:[#allocation8 + $0x38] sm:$0xff]  ;;  %v345_v3 = vld [vmem:[#allocation8 + $0x30] sm:$0xff]  ;;  %v336_v4 = vld [vmem:[#allocation6 + $0x28] sm:$0xff]  ;;  %s251_s29 = sshll.u32 %s464_s2, 4  ;;  %s252_s29 = int_to_ptr.vmem [resolvable:$true] %s251_s29 }
  0x11   :  { %222 = vmatpush.bf16.msra.mxu1 %v346_v2  ;;  %v344_v5 = vld [vmem:[#allocation8 + $0x28] sm:$0xff]  ;;  %v335_v6 = vld [vmem:[#allocation6 + $0x20] sm:$0xff]  ;;  %v334_v8 = vld [vmem:[#allocation6 + $0x18] sm:$0xff] }
  0x12   :  { %v343_v7 = vld [vmem:[#allocation8 + $0x20] sm:$0xff]  ;;  %v342_v9 = vld [vmem:[#allocation8 + $0x18] sm:$0xff]  ;;  %v333_v10 = vld [vmem:[#allocation6 + $0x10] sm:$0xff] }
  0x13   :  { %v332_v11 = vld [vmem:[#allocation6 + $0x8] sm:$0xff]  ;;  %v331_v12 = vld [vmem:[#allocation6] sm:$0xff]  ;;  %v68_v13 = vld [vmem:[#allocation3] sm:$0xff] }
  0x14   :  { %136 = vmatpush.bf16.msra.mxu0 %v337_v1  ;;  %v69_v14 = vld [vmem:[#allocation3 + $0x8] sm:$0xff]  ;;  %v341_v16 = vld [vmem:[#allocation8 + $0x10] sm:$0xff]  ;;  %v340_v17 = vld [vmem:[#allocation8 + $0x8] sm:$0xff] }
  0x15   :  { %223 = vmatpush.bf16.msra.mxu1 %v345_v3  ;;  %v70_v15 = vpack.c.bf16 %v69_v14, %v68_v13  ;;  %v339_v18 = vld [vmem:[#allocation8] sm:$0xff] }
  0x18   :  { %137 = vmatpush.bf16.msra.mxu0 %v336_v4 }
  0x19   :  { %224 = vmatpush.bf16.msra.mxu1 %v344_v5 }
  0x1c   :  { %138 = vmatpush.bf16.msra.mxu0 %v335_v6 }
  0x1d   :  { %225 = vmatpush.bf16.msra.mxu1 %v343_v7 }
  0x20   :  { %139 = vmatpush.bf16.msra.mxu0 %v334_v8 }
  0x21   :  { %226 = vmatpush.bf16.msra.mxu1 %v342_v9 }
  0x24   :  { %140 = vmatpush.bf16.msra.mxu0 %v333_v10 }
  0x25   :  { %227 = vmatpush.bf16.msra.mxu1 %v341_v16 }
  0x28   :  { %141 = vmatpush.bf16.msra.mxu0 %v332_v11 }
  0x29   :  { %228 = vmatpush.bf16.msra.mxu1 %v340_v17 }
  0x2c   :  { %142 = vmatpush.bf16.msra.mxu0 %v331_v12 }
  0x2d   :  { %229 = vmatpush.bf16.msra.mxu1 %v339_v18 }
  0x2f   :  { %143 = vmatmul.bf16.vlgmr.msra.gmra.mxu0 %v70_v15 }
  0xac   :  { %v144_v19 = vpop.f32.mrf.mxu0 }
  0xad   :  { %v153_v21 = vmax.f32 %v144_v19, 0.0 }
  0xb4   :  { %v146_v20 = vpop.f32.mrf.mxu0 }
  0xb5   :  { %v154_v22 = vmax.f32 %v146_v20, 0.0 }
  0xb7   :  { %v155_v23 = vpack.c.bf16 %v154_v22, %v153_v21 }
  0xb9   :  { %230 = vmatmul.bf16.vlgmr.msra.gmra.mxu1 %v155_v23 }
 0x136   :  { %v231_v24 = vpop.f32.mrf.mxu1 }
 0x137   :  { %245 = vst [vmem:[#allocation9] sm:$0xff] %v231_v24 }
 0x13e   :  { %v233_v25 = vpop.f32.mrf.mxu1 }
 0x13f   :  { %246 = vst [vmem:[#allocation9 + $0x8] sm:$0xff] %v233_v25 }
 0x140   :  { %259 = dma.vmem_to_hbm [thread:$0]  %s252_s29, 256, %s254_s5, [#allocation5], %s461_s24, %s461_s24, %s462_s25  }
 0x141   :  { %455 = dma.done.wait [#allocation5], 256  }
 0x142   :  { %456 = vsyncadd [#allocation5], 4294967040 }
 0x143   :  { %264 = vsyncpa [#allocation4], 1 }
 0x144   :  { %265 = vsyncpa [#allocation7], 1 }
 0x145   :  { %266 = vsyncpa [#allocation5], 1 }

</bundles_post_ra>
